<compile_context>
chip_gen: v5e
topology: v5e:2x2
jax: 0.10.0
libtpu: 0.0.40
codegen_flags: <defaults>
</compile_context>

<pallas_src>
import math

import jax
import jax.numpy as jnp
from jax.experimental import pallas as pl
from jax.experimental.pallas import tpu as pltpu

LATENT_SIZE = 4
BN_EPS = 1e-5
LANE = 128
ONES_LANE = LANE - 1          # lane carrying the constant 1.0 used for the folded bias

# Per-layer (in_dim, out_dim, has_batchnorm), encoder then decoder, in forward order.
LAYER_CFG = [
    (12, 32, True),            # encoder.fc1 + fc_bn1
    (32, 64, True),            # encoder.fc2 + fc_bn2
    (64, 8, True),             # encoder.fc3 + fc_bn3
    (8, LATENT_SIZE, False),   # encoder.fc4  (latent, ReLU only)
    (LATENT_SIZE, 8, True),    # decoder.fc4 + fc_bn4
    (8, 64, True),             # decoder.fc5 + fc_bn5
    (64, 32, True),            # decoder.fc6 + fc_bn6
    (32, 12, False),           # decoder.fc7  (output, ReLU only)
]
N_LAYERS = len(LAYER_CFG)
IN_DIM = LAYER_CFG[0][0]
OUT_DIM = LAYER_CFG[-1][1]


def ae_kernel(x_ref, w_ref, vec_ref, o_ref):
    """Whole AE forward (8 fused Linear+ReLU[+BN] layers) in one kernel invocation."""
    bsz = x_ref.shape[0]

    # Build the lane-dense activation slab in place in the output buffer:
    # lanes [0,12) = x, lane 127 = constant 1.0 (bias lane), everything else 0.
    o_ref[...] = jnp.zeros_like(o_ref)
    o_ref[:, :IN_DIM] = x_ref[...]
    o_ref[:, ONES_LANE:] = jnp.ones((bsz, 1), jnp.float32)
    h0 = o_ref[...]

    def layer(i, h):
        w = w_ref[i]                        # [128,128] bf16 (bias folded into row 127)
        v = vec_ref[i]                      # [8,128]  f32
        gamma = v[0:1, :]                   # [1,128]
        beta = v[1:2, :]                    # [1,128]
        bn_flag = v[2:3, :]                 # [1,128]  1.0 where this layer has BatchNorm

        y = jnp.dot(h.astype(jnp.bfloat16), w,
                    preferred_element_type=jnp.float32)    # MXU, f32 accumulate
        h = jnp.maximum(y, 0.0)                            # Linear(+bias) + ReLU

        # Branchless training-mode BatchNorm1d (applied AFTER ReLU, as in the module).
        mu = jnp.mean(h, axis=0, keepdims=True)            # [1,128]  XLU reduce
        m2 = jnp.mean(h * h, axis=0, keepdims=True)        # [1,128]  independent reduce
        var = jnp.maximum(m2 - mu * mu, 0.0)               # biased batch variance
        s = gamma * jax.lax.rsqrt(var + BN_EPS)            # rsqrt rides the EUP slot
        h_bn = h * s + (beta - mu * s)                     # single fused apply
        return jnp.where(bn_flag > 0.5, h_bn, h)

    o_ref[...] = jax.lax.fori_loop(0, N_LAYERS, layer, h0)


def init_params(key):
    """PyTorch-default-style init, packed into the two lane-dense slabs.

    Returns (w_slab [L,128,128] bf16, vec_slab [L,8,128] f32, raw_params) where
    raw_params keeps the unpadded f32 tensors for the pure-JAX reference.
    """
    w_slab = jnp.zeros((N_LAYERS, LANE, LANE), jnp.float32)
    vec_slab = jnp.zeros((N_LAYERS, 8, LANE), jnp.float32)
    raw_params = []
    for i, (fan_in, fan_out, has_bn) in enumerate(LAYER_CFG):
        key, kw, kb = jax.random.split(key, 3)
        bound = 1.0 / math.sqrt(float(fan_in))
        # Stored already transposed to [in, out] (i.e. nn.Linear.weight.T).
        w_t = jax.random.uniform(kw, (fan_in, fan_out), jnp.float32, -bound, bound)
        b = jax.random.uniform(kb, (fan_out,), jnp.float32, -bound, bound)
        gamma = jnp.ones((fan_out,), jnp.float32)      # BatchNorm1d default weight
        beta = jnp.zeros((fan_out,), jnp.float32)      # BatchNorm1d default bias

        w_slab = w_slab.at[i, :fan_in, :fan_out].set(w_t)
        w_slab = w_slab.at[i, ONES_LANE, :fan_out].set(b)       # fold bias into row 127
        w_slab = w_slab.at[i, ONES_LANE, ONES_LANE].set(1.0)    # propagate the ones-lane
        if has_bn:
            vec_slab = vec_slab.at[i, 0, :fan_out].set(gamma)
            vec_slab = vec_slab.at[i, 1, :fan_out].set(beta)
            vec_slab = vec_slab.at[i, 1, ONES_LANE].set(1.0)    # keep bias lane == 1 thru BN
            vec_slab = vec_slab.at[i, 2, :].set(1.0)            # BN flag row
        raw_params.append((w_t, b, gamma, beta))
    return w_slab.astype(jnp.bfloat16), vec_slab, raw_params


@jax.jit
def ae_forward(x, w_slab, vec_slab):
    """Fused forward.  x: [B,12] f32 -> lane-dense [B,128] f32 whose first 12 lanes are
    the reconstruction (lanes 12..126 are zero, lane 127 is the constant bias lane);
    downstream consumers should read the lane-dense slab directly."""
    batch = x.shape[0]
    flops = 2 * batch * LANE * LANE * N_LAYERS
    bytes_accessed = (x.size * 4 + w_slab.size * 2 + vec_slab.size * 4
                      + batch * LANE * 4)
    vmem = pl.BlockSpec(memory_space=pltpu.MemorySpace.VMEM)
    return pl.pallas_call(
        ae_kernel,
        out_shape=jax.ShapeDtypeStruct((batch, LANE), jnp.float32),
        in_specs=[vmem, vmem, vmem],
        out_specs=vmem,
        cost_estimate=pl.CostEstimate(
            flops=flops,
            transcendentals=N_LAYERS * LANE,   # one rsqrt row per layer (branchless BN)
            bytes_accessed=bytes_accessed,
        ),
    )(x, w_slab, vec_slab)


def ae_reference(x, raw_params):
    """Pure-JAX reference of the same forward pass.

    Mirrors the kernel's precision (bf16 MXU operands / bf16-stored bias, f32 elsewhere)
    and the module's semantics: ReLU on every layer (including latent and output),
    training-mode BatchNorm with batch statistics (biased variance, eps=1e-5, affine)
    applied AFTER ReLU.
    """
    h = x
    for (w_t, b, gamma, beta), (_, _, has_bn) in zip(raw_params, LAYER_CFG):
        b16 = b.astype(jnp.bfloat16).astype(jnp.float32)
        y = jnp.dot(h.astype(jnp.bfloat16), w_t.astype(jnp.bfloat16),
                    preferred_element_type=jnp.float32) + b16
        h = jnp.maximum(y, 0.0)
        if has_bn:
            mu = jnp.mean(h, axis=0, keepdims=True)
            var = jnp.mean((h - mu) ** 2, axis=0, keepdims=True)
            h = gamma * (h - mu) * jax.lax.rsqrt(var + BN_EPS) + beta
    return h


if __name__ == "__main__":
    key = jax.random.PRNGKey(0)
    key, kx = jax.random.split(key)
    batch = 16   # small demo batch; per-call cost is ~flat up to 128 (v5e) / 256 (v6e/v7x) rows
    x = jax.random.normal(kx, (batch, IN_DIM), jnp.float32)
    w_slab, vec_slab, raw_params = init_params(key)

    out = jax.block_until_ready(ae_forward(x, w_slab, vec_slab))
    assert out.shape == (batch, LANE), out.shape

    recon = out[:, :OUT_DIM]                 # slice only for the correctness check
    ref = ae_reference(x, raw_params)
    max_diff = float(jnp.max(jnp.abs(recon - ref)))
    # Tolerance reflects bf16 MXU operands + fused-vs-two-pass BN variance rounding.
    assert jnp.allclose(recon, ref, atol=2e-2, rtol=2e-2), max_diff
    # Padded lanes must stay clean through all 8 layers.
    assert float(jnp.max(jnp.abs(out[:, OUT_DIM:ONES_LANE]))) <= 1e-6
    print("KERNEL_OK")
</pallas_src>

<mosaic_0001>
module attributes {stable_mosaic.version = 11 : i64} {
  func.func @ae_kernel(%arg0: memref<16x12xf32, #tpu.memory_space<vmem>>, %arg1: memref<8x128x128xbf16, #tpu.memory_space<vmem>>, %arg2: memref<8x8x128xf32, #tpu.memory_space<vmem>>, %arg3: memref<16x128xf32, #tpu.memory_space<vmem>>) attributes {dimension_semantics = [], scalar_prefetch = 0 : i64, scratch_operands = 0 : i64, tpu.core_type = #tpu.core_type<tc>} {
    %cst = arith.constant 0.000000e+00 : f32
    %0 = vector.broadcast %cst : f32 to vector<16x128xf32>
    %c0 = arith.constant 0 : index
    %c0_0 = arith.constant 0 : index
    %1 = vector.load %arg3[%c0, %c0_0] : memref<16x128xf32, #tpu.memory_space<vmem>>, vector<16x128xf32>
    tpu.vector_store %arg3[%c0, %c0_0], %0 {strides = array<i32>} : memref<16x128xf32, #tpu.memory_space<vmem>>, vector<16x128xf32>,
    %c0_1 = arith.constant 0 : index
    %c0_2 = arith.constant 0 : index
    %2 = vector.load %arg0[%c0_1, %c0_2] : memref<16x12xf32, #tpu.memory_space<vmem>>, vector<16x12xf32>
    %c0_3 = arith.constant 0 : index
    %c0_4 = arith.constant 0 : index
    %3 = vector.load %arg3[%c0_3, %c0_4] : memref<16x128xf32, #tpu.memory_space<vmem>>, vector<16x12xf32>
    tpu.vector_store %arg3[%c0_3, %c0_4], %2 {strides = array<i32>} : memref<16x128xf32, #tpu.memory_space<vmem>>, vector<16x12xf32>,
    %cst_5 = arith.constant 1.000000e+00 : f32
    %4 = vector.broadcast %cst_5 : f32 to vector<16x1xf32>
    %c0_6 = arith.constant 0 : index
    %c127 = arith.constant 127 : index
    %5 = vector.load %arg3[%c0_6, %c127] : memref<16x128xf32, #tpu.memory_space<vmem>>, vector<16x1xf32>
    tpu.vector_store %arg3[%c0_6, %c127], %4 {strides = array<i32>} : memref<16x128xf32, #tpu.memory_space<vmem>>, vector<16x1xf32>,
    %c0_7 = arith.constant 0 : index
    %c0_8 = arith.constant 0 : index
    %6 = vector.load %arg3[%c0_7, %c0_8] : memref<16x128xf32, #tpu.memory_space<vmem>>, vector<16x128xf32>
    %c0_i32 = arith.constant 0 : i32
    %c8_i32 = arith.constant 8 : i32
    %7 = arith.addi %c0_i32, %c8_i32 : i32
    %c1_i32 = arith.constant 1 : i32
    %8 = scf.for %arg4 = %c0_i32 to %7 step %c1_i32 iter_args(%arg5 = %6) -> (vector<16x128xf32>)  : i32 {
      %10 = arith.index_cast %arg4 : i32 to index
      %c0_12 = arith.constant 0 : index
      %c0_13 = arith.constant 0 : index
      %11 = vector.load %arg1[%10, %c0_12, %c0_13] : memref<8x128x128xbf16, #tpu.memory_space<vmem>>, vector<1x128x128xbf16>
      %12 = vector.shape_cast %11 : vector<1x128x128xbf16> to vector<128x128xbf16>
      %13 = arith.index_cast %arg4 : i32 to index
      %c0_14 = arith.constant 0 : index
      %c0_15 = arith.constant 0 : index
      %14 = vector.load %arg2[%13, %c0_14, %c0_15] : memref<8x8x128xf32, #tpu.memory_space<vmem>>, vector<1x8x128xf32>
      %15 = vector.shape_cast %14 : vector<1x8x128xf32> to vector<8x128xf32>
      %16 = vector.extract_strided_slice %15 {offsets = [0, 0], sizes = [1, 128], strides = [1, 1]} : vector<8x128xf32> to vector<1x128xf32>
      %17 = vector.extract_strided_slice %15 {offsets = [1, 0], sizes = [1, 128], strides = [1, 1]} : vector<8x128xf32> to vector<1x128xf32>
      %18 = vector.extract_strided_slice %15 {offsets = [2, 0], sizes = [1, 128], strides = [1, 1]} : vector<8x128xf32> to vector<1x128xf32>
      %19 = arith.truncf %arg5 : vector<16x128xf32> to vector<16x128xbf16>
      %cst_16 = arith.constant dense<0.000000e+00> : vector<16x128xf32>
      %20 = tpu.matmul %19, %12, %cst_16 {dimension_numbers = #tpu.dot_dimension_numbers<[1], [0], [0], [1], [0, 0, 1, 1], [], []>} : vector<16x128xbf16>, vector<128x128xbf16>, vector<16x128xf32> -> vector<16x128xf32>
      %cst_17 = arith.constant 0.000000e+00 : f32
      %21 = vector.broadcast %cst_17 : f32 to vector<16x128xf32>
      %22 = arith.maximumf %20, %21 : vector<16x128xf32>
      %cst_18 = arith.constant dense<0.000000e+00> : vector<128xf32>
      %23 = vector.multi_reduction <add>, %22, %cst_18 [0] : vector<16x128xf32> to vector<128xf32>
      %24 = vector.shape_cast %23 : vector<128xf32> to vector<1x128xf32>
      %cst_19 = arith.constant 1.600000e+01 : f32
      %25 = vector.broadcast %cst_19 : f32 to vector<1x128xf32>
      %26 = arith.divf %24, %25 : vector<1x128xf32>
      %27 = arith.mulf %22, %22 : vector<16x128xf32>
      %cst_20 = arith.constant dense<0.000000e+00> : vector<128xf32>
      %28 = vector.multi_reduction <add>, %27, %cst_20 [0] : vector<16x128xf32> to vector<128xf32>
      %29 = vector.shape_cast %28 : vector<128xf32> to vector<1x128xf32>
      %cst_21 = arith.constant 1.600000e+01 : f32
      %30 = vector.broadcast %cst_21 : f32 to vector<1x128xf32>
      %31 = arith.divf %29, %30 : vector<1x128xf32>
      %32 = arith.mulf %26, %26 : vector<1x128xf32>
      %33 = arith.subf %31, %32 : vector<1x128xf32>
      %cst_22 = arith.constant 0.000000e+00 : f32
      %34 = vector.broadcast %cst_22 : f32 to vector<1x128xf32>
      %35 = arith.maximumf %33, %34 : vector<1x128xf32>
      %cst_23 = arith.constant 9.99999974E-6 : f32
      %36 = vector.broadcast %cst_23 : f32 to vector<1x128xf32>
      %37 = arith.addf %35, %36 : vector<1x128xf32>
      %38 = math.rsqrt %37 : vector<1x128xf32>
      %39 = arith.mulf %16, %38 : vector<1x128xf32>
      %40 = vector.broadcast %39 : vector<1x128xf32> to vector<16x128xf32>
      %41 = arith.mulf %22, %40 : vector<16x128xf32>
      %42 = arith.mulf %26, %39 : vector<1x128xf32>
      %43 = arith.subf %17, %42 : vector<1x128xf32>
      %44 = vector.broadcast %43 : vector<1x128xf32> to vector<16x128xf32>
      %45 = arith.addf %41, %44 : vector<16x128xf32>
      %cst_24 = arith.constant 5.000000e-01 : f32
      %46 = vector.broadcast %cst_24 : f32 to vector<1x128xf32>
      %47 = arith.cmpf ogt, %18, %46 : vector<1x128xf32>
      %48 = vector.shape_cast %47 : vector<1x128xi1> to vector<1x128xi1>
      %49 = vector.broadcast %48 : vector<1x128xi1> to vector<16x128xi1>
      %50 = arith.select %49, %45, %22 : vector<16x128xi1>, vector<16x128xf32>
      scf.yield %50 : vector<16x128xf32>
    }
    %c8_i32_9 = arith.constant 8 : i32
    %c0_10 = arith.constant 0 : index
    %c0_11 = arith.constant 0 : index
    %9 = vector.load %arg3[%c0_10, %c0_11] : memref<16x128xf32, #tpu.memory_space<vmem>>, vector<16x128xf32>
    tpu.vector_store %arg3[%c0_10, %c0_11], %8 {strides = array<i32>} : memref<16x128xf32, #tpu.memory_space<vmem>>, vector<16x128xf32>,
    return
  }
}

</mosaic_0001>

<bundles_post_ra>
// kernel: ae_forward.1
= control target key start
LH: loop header
LB: loop body
LE: loop exit
PB: predicated region body
PF: predicated region fallthrough
CT: control target
= control target key end

     0   :  { %8 = vsyncpa [#allocation3], 0  ;;  %s546_s0 = inlined_call_operand.hbm [shape: f32[16,12], index: 0, kind: input, shape index: {}]   ;;  %s547_s1 = inlined_call_operand.hbm [shape: bf16[8,128,128], index: 1, kind: input, shape index: {}]   ;;  %s548_s2 = inlined_call_operand.hbm [shape: f32[8,8,128], index: 2, kind: input, shape index: {}]   ;;  %s549_s3 = inlined_call_operand.hbm [shape: f32[16,128], index: 3, kind: output, shape index: {}]  }
   0x1   :  { %9 = vsyncpa [#allocation6], 0  ;;  %s28_s14 = sshll.u32 %s547_s1, 4  ;;  %s29_s14 = int_to_ptr.hbm [resolvable:$true] %s28_s14 }
   0x2   :  { %10 = vsyncpa [#allocation4], 0  ;;  %s473_s15 = smov [#allocation5]   ;;  %s15_s19 = sshll.u32 %s546_s0, 4  ;;  %s16_s19 = int_to_ptr.hbm [resolvable:$true] %s15_s19 }
   0x3   :  { %s30_s16 = sshll.u32 %s473_s15, 4  ;;  %s474_s20 = smov 64   ;;  %s31_s16 = int_to_ptr.vmem [resolvable:$true] %s30_s16 }
   0x4   :  { %s475_s21 = smov 4   ;;  %s476_s22 = smov [#allocation2]  }
   0x5   :  { %36 = dma.hbm_to_vmem [thread:$0]  %s29_s14, 8192, %s31_s16, [#allocation6], %s474_s20, %s474_s20, %s475_s21  }
   0x6   :  { %s17_s23 = sshll.u32 %s476_s22, 4  ;;  %s477_s24 = smov 128   ;;  %s18_s23 = int_to_ptr.vmem [resolvable:$true] %s17_s23 }
   0x7   :  { %s478_s25 = smov 8   ;;  %s41_s27 = sshll.u32 %s548_s2, 4  ;;  %s42_s27 = int_to_ptr.hbm [resolvable:$true] %s41_s27 }
   0x8   :  { %23 = dma.hbm_to_vmem [thread:$0]  %s16_s19, 256, %s18_s23, [#allocation3], %s477_s24, %s477_s24, %s478_s25  }
   0x9   :  { %s479_s28 = smov [#allocation7]  }
   0xa   :  { %s43_s0 = sshll.u32 %s479_s28, 4  ;;  %s44_s0 = int_to_ptr.vmem [resolvable:$true] %s43_s0 }
   0xb   :  { %49 = dma.hbm_to_vmem [thread:$0]  %s42_s27, 1024, %s44_s0, [#allocation6], %s477_s24, %s477_s24, %s478_s25  }
   0xc   :  { %455 = dma.done.wait [#allocation3], 256  }
   0xd   :  { %456 = vsyncadd [#allocation3], 4294967040 }
   0xe   :  { %457 = dma.done.wait [#allocation6], 9216  }
   0xf   :  { %458 = vsyncadd [#allocation6], 4294958080  ;;  %v480_v0 = vmov 0.0   ;;  %vm66_vm0 = vcmask 97280   ;;  %v64_v1 = vld [vmem:[#allocation2] sm:$0xff]  ;;  %v65_v2 = vld [vmem:[#allocation2 + $0x8] sm:$0xff] }
  0x10   :  { %62 = vst [vmem:[#allocation8] sm:$0xff] %v480_v0  ;;  %vm69_vm1 = vcmask 1048568   ;;  %v481_v3 = vmov 1.0   ;;  %s524_s2 = smov 0  }
  0x11   :  { %63 = vst [vmem:[#allocation8 + $0x8] sm:$0xff] %v480_v0 }
  0x12   :  { %67 = vst.msk [vmem:[#allocation8] sm:$0xff] %vm66_vm0, %v64_v1 }
  0x13   :  { %68 = vst.msk [vmem:[#allocation8 + $0x8] sm:$0xff] %vm66_vm0, %v65_v2 }
  0x14   :  { %70 = vst.msk [vmem:[#allocation8] sm:$0xff] %vm69_vm1, %v481_v3 }
  0x15   :  { %71 = vst.msk [vmem:[#allocation8 + $0x8] sm:$0xff] %vm69_vm1, %v481_v3 }
  0x1b   :  { %v72_v4 = vld [vmem:[#allocation8] sm:$0xff]  }
  0x1c   :  { %v73_v5 = vld [vmem:[#allocation8 + $0x8] sm:$0xff]  }
  0x1d LB: > { %s298_s29 = sshll.u32 %s471_s2, 6  ;;  %v104_v14 = vpack.c.bf16 %v463_v5, %v467_v4  ;;  %v482_v15 = vmov 16.0   ;;  %s265_s4 = sshll.u32 %s471_s2, 3  ;;  %v483_v58 = vmov 0   ;;  %s471_s2 = sphi %s524_s2, %s79_s2   ;;  %v467_v4 = vphi %v72_v4, %v551_v4   ;;  %v463_v5 = vphi %v73_v5, %v550_v5  }
  0x1e   : > { %s84_s30 = scalar_lea.vmem [#allocation5], %s298_s29  ;;  %343 = vrcp.f32 %v482_v15  ;;  %s102_s5 = scalar_lea.vmem [#allocation7], %s265_s4 }
  0x1f   : > { %v306_v6 = vld [vmem:[%s84_s30 + $0x38] sm:$0xff]  ;;  %v305_v7 = vld [vmem:[%s84_s30 + $0x30] sm:$0xff]  ;;  %v304_v8 = vld [vmem:[%s84_s30 + $0x28] sm:$0xff]  ;;  %s79_s2 = sadd.s32 1, %s471_s2  }
  0x20   : > { %153 = vmatpush.bf16.msra.mxu0 %v306_v6  ;;  %v303_v9 = vld [vmem:[%s84_s30 + $0x20] sm:$0xff]  ;;  %v302_v10 = vld [vmem:[%s84_s30 + $0x18] sm:$0xff]  ;;  %v301_v11 = vld [vmem:[%s84_s30 + $0x10] sm:$0xff]  ;;  %p76_p0 = scmp.ge.s32.totalorder %s79_s2, 8  }
  0x21   : > { %v300_v12 = vld [vmem:[%s84_s30 + $0x8] sm:$0xff]  ;;  %v299_v13 = vld [vmem:[%s84_s30] sm:$0xff]  ;;  %s234_s8 = sshll.u32 (%p76_p0), %s549_s3, 4  ;;  %s484_s9 = smov (%p76_p0), [#allocation8]   ;;  %s235_s8 = int_to_ptr.hbm [resolvable:$true] %s234_s8 }
  0x22   : > { %v103_v53 = vld [vmem:[%s102_s5] sm:$0xff]  ;;  %s232_s10 = sshll.u32 (%p76_p0), %s484_s9, 4  ;;  %s233_s10 = int_to_ptr.vmem [resolvable:$true] %s232_s10 }
  0x23   : > { %vm220_vm6 = vcmp.gt.f32.partialorder %v103_v53, 0.5 }
  0x24   : > { %154 = vmatpush.bf16.msra.mxu0 %v305_v7  ;;  %v344_v17 = vpop.eup %343  ;;  %v221_v59 = vsel %vm220_vm6, 1, %v483_v58 }
  0x25   : > { %v177_v18 = vmul.f32 16.0, %v344_v17  ;;  %vm181_vm2 = vweird.f32 %v344_v17  ;;  %v222_v62 = vperm.slane %v221_v59, 2 }
  0x27   : > { %v178_v22 = vsub.f32 1.0, %v177_v18  ;;  %vm223_vm7 = vcmp.eq.s32.totalorder %v222_v62, 1 }
  0x28   : > { %155 = vmatpush.bf16.msra.mxu0 %v304_v8 }
  0x29   : > { %v179_v28 = vmul.f32 %v344_v17, %v178_v22 }
  0x2b   : > { %v180_v33 = vadd.f32 %v344_v17, %v179_v28 }
  0x2c   : > { %156 = vmatpush.bf16.msra.mxu0 %v303_v9 }
  0x2d   : > { %v182_v38 = vsel %vm181_vm2, %v344_v17, %v180_v33 }
  0x30   : > { %157 = vmatpush.bf16.msra.mxu0 %v302_v10 }
  0x34   : > { %158 = vmatpush.bf16.msra.mxu0 %v301_v11 }
  0x38   : > { %159 = vmatpush.bf16.msra.mxu0 %v300_v12 }
  0x3c   : > { %160 = vmatpush.bf16.msra.mxu0 %v299_v13 }
  0x3f   : > { %161 = vmatmul.bf16.vlgmr.msra.gmra.mxu0 %v104_v14 }
  0xbc   : > { %v162_v16 = vpop.f32.mrf.mxu0 }
  0xbd   : > { %v167_v19 = vmax.f32 %v162_v16, 0.0 }
  0xbf   : > { %v184_v23 = vmul.f32 %v167_v19, %v167_v19 }
  0xc4   : > { %v164_v20 = vpop.f32.mrf.mxu0 }
  0xc5   : > { %v168_v21 = vmax.f32 %v164_v20, 0.0 }
  0xc7   : > { %v169_v24 = vadd.f32 %v168_v21, %v167_v19  ;;  %v185_v25 = vmul.f32 %v168_v21, %v168_v21 }
  0xc9   : > { %v170_v26 = vrot.slane %v169_v24, 4  ;;  %v186_v27 = vadd.f32 %v185_v25, %v184_v23 }
  0xcb   : > { %v171_v29 = vadd.f32 %v170_v26, %v169_v24  ;;  %v187_v30 = vrot.slane %v186_v27, 4 }
  0xcd   : > { %v172_v31 = vrot.slane %v171_v29, 2  ;;  %v188_v32 = vadd.f32 %v187_v30, %v186_v27 }
  0xcf   : > { %v173_v34 = vadd.f32 %v172_v31, %v171_v29  ;;  %v189_v35 = vrot.slane %v188_v32, 2 }
  0xd1   : > { %v174_v36 = vrot.slane %v173_v34, 1  ;;  %v190_v37 = vadd.f32 %v189_v35, %v188_v32 }
  0xd3   : > { %v175_v39 = vadd.f32 %v174_v36, %v173_v34  ;;  %v191_v40 = vrot.slane %v190_v37, 1 }
  0xd5   : > { %v183_v41 = vmul.f32 %v182_v38, %v175_v39  ;;  %v192_v42 = vadd.f32 %v191_v40, %v190_v37 }
  0xd7   : > { %v193_v43 = vmul.f32 %v192_v42, %v182_v38  ;;  %v194_v44 = vmul.f32 %v183_v41, %v183_v41 }
  0xd9   : > { %v195_v45 = vsub.f32 %v193_v43, %v194_v44 }
  0xdb   : > { %v196_v46 = vmax.f32 %v195_v45, 0.0 }
  0xdd   : > { %v197_v47 = vadd.f32 1e-05, %v196_v46 }
  0xdf   : > { %345 = vrsqrt.f32 %v197_v47  ;;  %vm204_vm4 = vweird.f32 %v197_v47 }
  0xe5   : > { %v346_v48 = vpop.eup %345 }
  0xe6   : > { %v199_v49 = vmul.f32 %v346_v48, %v197_v47  ;;  %vm205_vm3 = vweird.f32 %v346_v48 }
  0xe7   : > { %vm206_vm5 = vmor %vm204_vm4, %vm205_vm3 }
  0xe8   : > { %v200_v50 = vmul.f32 %v346_v48, %v199_v49 }
  0xea   : > { %v201_v51 = vmul.f32 0.5, %v200_v50 }
  0xec   : > { %v202_v52 = vsub.f32 1.5, %v201_v51 }
  0xee   : > { %v203_v54 = vmul.f32 %v346_v48, %v202_v52 }
  0xf0   : > { %v207_v55 = vsel %vm206_vm5, %v346_v48, %v203_v54 }
  0xf1   : > { %v208_v56 = vmul.f32 %v207_v55, %v103_v53 }
  0xf3   : > { %v212_v57 = vmul.f32 %v208_v56, %v183_v41  ;;  %v209_v60 = vperm.slane %v208_v56, 0 }
  0xf5   : > { %v214_v61 = vrot.slane %v212_v57, 7  ;;  %v210_v0 = vmul.f32 %v209_v60, %v167_v19  ;;  %v211_v1 = vmul.f32 %v209_v60, %v168_v21 }
  0xf7   : > { %v216_v63 = vsub.f32 %v103_v53, %v214_v61 }
  0xf9   : > { %v217_v2 = vperm.slane %v216_v63, 1 }
  0xfa   :  { %78 = sbr.rel (!%p76_p0) target bundleno = 29 (0x1d), region = 53 }
  0xfb   : > { %v218_v3 = vadd.f32 %v217_v2, %v210_v0  ;;  %v219_v4 = vadd.f32 %v217_v2, %v211_v1 }
  0xfd   : > { %v224_v6 = vsel %vm223_vm7, %v218_v3, %v167_v19   ;;  %v225_v7 = vsel %vm223_vm7, %v219_v4, %v168_v21  }
  0xfe   : > { %v550_v5 = vmov %v225_v7  ;;  %v551_v4 = vmov %v224_v6  ;;  %226 = vst [vmem:[#allocation8] sm:$0xff] (%p76_p0), %v224_v6 }
  0xff   :  { %227 = vst [vmem:[#allocation8 + $0x8] sm:$0xff] %v225_v7 }
 0x100   :  { %240 = dma.vmem_to_hbm [thread:$0]  %s233_s10, 256, %s235_s8, [#allocation4], %s477_s24, %s477_s24, %s478_s25  }
 0x101   :  { %459 = dma.done.wait [#allocation4], 256  }
 0x102   :  { %460 = vsyncadd [#allocation4], 4294967040 }
 0x103   :  { %245 = vsyncpa [#allocation3], 1 }
 0x104   :  { %246 = vsyncpa [#allocation6], 1 }
 0x105   :  { %247 = vsyncpa [#allocation4], 1 }

</bundles_post_ra>
